<compile_context>
chip_gen: v6e
topology: v6e:2x2x1
jax: 0.10.0
libtpu: 0.0.40
codegen_flags: <defaults>
</compile_context>

<pallas_src>
import math

import jax
import jax.numpy as jnp
from jax.experimental import pallas as pl
from jax.experimental.pallas import tpu as pltpu


def _mlp_kernel(x_ref,
                w1_ref, b1_ref,
                w2_ref, b2_ref,
                w3_ref, b3_ref,
                w4_ref, b4_ref,
                w5_ref, b5_ref,
                o_ref):
    """Fused 5-layer MLP forward on one (TB, F) batch tile (all VMEM)."""
    h = x_ref[...]

    def linear(h, w_ref, b_ref):
        return jnp.dot(h, w_ref[...],
                       preferred_element_type=jnp.float32) + b_ref[...]

    h = jnp.maximum(linear(h, w1_ref, b1_ref), 0.0)
    h = jnp.maximum(linear(h, w2_ref, b2_ref), 0.0)
    h = jnp.maximum(linear(h, w3_ref, b3_ref), 0.0)
    h = jnp.maximum(linear(h, w4_ref, b4_ref), 0.0)
    # Final layer: no ReLU.
    # TODO(synk): output block is (TB, 1), i.e. lane-sparse; a lane-dense
    # (1, TB) writeback would need a sublane->lane relayout inside the kernel.
    # TB is kept large so the masked stores amortize per grid step, and the
    # output slab (B*4 bytes) is tiny vs. the (B*F*4) input read anyway.
    o_ref[...] = linear(h, w5_ref, b5_ref).astype(o_ref.dtype)


def _round_up(x, m):
    return (x + m - 1) // m * m


def _choose_tile(B, F, block_batch):
    if block_batch is not None:
        tb = _round_up(block_batch, 8)
    else:
        # Large tile amortizes the ~0.35us per-grid-step overhead, but cap the
        # x tile around 2 MiB so double-buffering stays far under every
        # generation's scoped VMEM limit (v7x: 32 MiB default of 64 physical).
        max_rows = max(8, ((2 << 20) // (max(F, 1) * 4)) // 8 * 8)
        tb = min(1024, max_rows)
    return max(8, min(tb, _round_up(B, 8)))


def neural_network4_forward(x, params, *, block_batch=None):
    """Forward pass. x: (B, ...) -> flattened to (B, N_features) like nn.Flatten()."""
    B = x.shape[0]
    x2d = x.reshape(B, -1).astype(jnp.float32)
    F = x2d.shape[1]
    assert params[0][0].shape[0] == F, (params[0][0].shape, F)

    # --- batch tile / padding -------------------------------------------------
    tb = _choose_tile(B, F, block_batch)
    b_pad = _round_up(B, tb)
    if b_pad != B:
        x2d = jnp.pad(x2d, ((0, b_pad - B), (0, 0)))
    grid = (b_pad // tb,)

    # --- specs ----------------------------------------------------------------
    x_spec = pl.BlockSpec((tb, F), lambda i: (i, 0))
    out_spec = pl.BlockSpec((tb, 1), lambda i: (i, 0))

    flat_args = []
    in_specs = [x_spec]
    param_bytes = 0
    for w, b in params:
        flat_args.append(w)
        flat_args.append(b)
        # Full-shape blocks, constant index map -> loaded once, VMEM-resident.
        in_specs.append(pl.BlockSpec(w.shape, lambda i: (0, 0)))
        in_specs.append(pl.BlockSpec(b.shape, lambda i: (0, 0)))
        param_bytes += (w.size + b.size) * 4

    # --- compiler params / cost estimate ---------------------------------------
    # Double-buffered x + out tiles, resident params, plus slack for
    # intermediate activations and Mosaic scratch.
    vmem_need = 2 * (tb * F + tb) * 4 + 2 * param_bytes + tb * 64 * 4 + (2 << 20)
    vmem_limit = int(min(max(4 * vmem_need, 8 << 20), 32 << 20))

    dims = [F] + [w.shape[1] for w, _ in params]
    flops = 2 * b_pad * sum(dims[i] * dims[i + 1] for i in range(len(dims) - 1))
    bytes_accessed = b_pad * (F + 1) * 4 + param_bytes

    out = pl.pallas_call(
        _mlp_kernel,
        out_shape=jax.ShapeDtypeStruct((b_pad, 1), jnp.float32),
        grid=grid,
        in_specs=in_specs,
        out_specs=out_spec,
        compiler_params=pltpu.CompilerParams(
            dimension_semantics=("parallel",),
            vmem_limit_bytes=vmem_limit,
        ),
        cost_estimate=pl.CostEstimate(
            flops=flops, transcendentals=0, bytes_accessed=bytes_accessed),
    )(x2d, *flat_args)

    return out[:B]


def init_params(n_features, key):
    """PyTorch-style uniform(-1/sqrt(fan_in), 1/sqrt(fan_in)) init.

    Weights are returned already transposed to (in, out) for the kernel;
    biases are shaped (1, out) for broadcast.
    """
    dims = [n_features, 32, 16, 8, 4, 1]
    params = []
    for i in range(len(dims) - 1):
        fan_in, fan_out = dims[i], dims[i + 1]
        key, kw, kb = jax.random.split(key, 3)
        bound = 1.0 / math.sqrt(fan_in)
        w = jax.random.uniform(kw, (fan_in, fan_out), jnp.float32,
                               minval=-bound, maxval=bound)
        b = jax.random.uniform(kb, (1, fan_out), jnp.float32,
                               minval=-bound, maxval=bound)
        params.append((w, b))
    return params


def reference_forward(x, params):
    """Pure-JAX reference for correctness checks."""
    B = x.shape[0]
    h = x.reshape(B, -1).astype(jnp.float32)
    for i, (w, b) in enumerate(params):
        h = jnp.dot(h, w, precision=jax.lax.Precision.HIGHEST) + b
        if i < len(params) - 1:
            h = jnp.maximum(h, 0.0)
    return h


if __name__ == "__main__":
    key = jax.random.PRNGKey(0)
    key, kx1, kx2 = jax.random.split(key, 3)

    # Small input: batch=8, features arranged as (4, 4) so Flatten is exercised.
    n_features = 4 * 4
    params = init_params(n_features, key)

    # Test 1: small batch, single grid step.
    x1 = jax.random.normal(kx1, (8, 4, 4), jnp.float32)
    out1 = jax.block_until_ready(neural_network4_forward(x1, params))
    ref1 = reference_forward(x1, params)
    assert out1.shape == (8, 1), out1.shape
    # Loose-ish tolerance: kernel MXU passes vs. XLA reference may use
    # different f32->bf16 pass counts.
    assert jnp.allclose(out1, ref1, atol=1e-2, rtol=1e-2), (
        float(jnp.max(jnp.abs(out1 - ref1))))

    # Test 2: batch not a multiple of the tile, multiple grid steps (exercises
    # padding + the batch-tiled pipeline).
    x2 = jax.random.normal(kx2, (300, 4, 4), jnp.float32)
    out2 = jax.block_until_ready(
        neural_network4_forward(x2, params, block_batch=128))
    ref2 = reference_forward(x2, params)
    assert out2.shape == (300, 1), out2.shape
    assert jnp.allclose(out2, ref2, atol=1e-2, rtol=1e-2), (
        float(jnp.max(jnp.abs(out2 - ref2))))

    print("KERNEL_OK")
</pallas_src>

<mosaic_0001>
module attributes {stable_mosaic.version = 11 : i64} {
  func.func @_mlp_kernel(%arg0: i32, %arg1: memref<8x16xf32, #tpu.memory_space<vmem>>, %arg2: memref<16x32xf32, #tpu.memory_space<vmem>>, %arg3: memref<1x32xf32, #tpu.memory_space<vmem>>, %arg4: memref<32x16xf32, #tpu.memory_space<vmem>>, %arg5: memref<1x16xf32, #tpu.memory_space<vmem>>, %arg6: memref<16x8xf32, #tpu.memory_space<vmem>>, %arg7: memref<1x8xf32, #tpu.memory_space<vmem>>, %arg8: memref<8x4xf32, #tpu.memory_space<vmem>>, %arg9: memref<1x4xf32, #tpu.memory_space<vmem>>, %arg10: memref<4x1xf32, #tpu.memory_space<vmem>>, %arg11: memref<1x1xf32, #tpu.memory_space<vmem>>, %arg12: memref<8x1xf32, #tpu.memory_space<vmem>>) attributes {dimension_semantics = [#tpu.dimension_semantics<parallel>], iteration_bounds = array<i64: 1>, scalar_prefetch = 0 : i64, scratch_operands = 0 : i64, tpu.core_type = #tpu.core_type<tc>, window_params = [{transform_indices = @transform_0, window_bounds = array<i64: 8, 16>}, {pipeline_mode = #tpu.pipeline_mode<synchronous>, transform_indices = @transform_1, window_bounds = array<i64: 16, 32>}, {pipeline_mode = #tpu.pipeline_mode<synchronous>, transform_indices = @transform_2, window_bounds = array<i64: 1, 32>}, {pipeline_mode = #tpu.pipeline_mode<synchronous>, transform_indices = @transform_3, window_bounds = array<i64: 32, 16>}, {pipeline_mode = #tpu.pipeline_mode<synchronous>, transform_indices = @transform_4, window_bounds = array<i64: 1, 16>}, {pipeline_mode = #tpu.pipeline_mode<synchronous>, transform_indices = @transform_5, window_bounds = array<i64: 16, 8>}, {pipeline_mode = #tpu.pipeline_mode<synchronous>, transform_indices = @transform_6, window_bounds = array<i64: 1, 8>}, {pipeline_mode = #tpu.pipeline_mode<synchronous>, transform_indices = @transform_7, window_bounds = array<i64: 8, 4>}, {pipeline_mode = #tpu.pipeline_mode<synchronous>, transform_indices = @transform_8, window_bounds = array<i64: 1, 4>}, {pipeline_mode = #tpu.pipeline_mode<synchronous>, transform_indices = @transform_9, window_bounds = array<i64: 4, 1>}, {pipeline_mode = #tpu.pipeline_mode<synchronous>, transform_indices = @transform_10, window_bounds = array<i64: 1, 1>}, {transform_indices = @transform_11, window_bounds = array<i64: 8, 1>}]} {
    %c0 = arith.constant 0 : index
    %c0_0 = arith.constant 0 : index
    %0 = vector.load %arg1[%c0, %c0_0] : memref<8x16xf32, #tpu.memory_space<vmem>>, vector<8x16xf32>
    %c0_1 = arith.constant 0 : index
    %c0_2 = arith.constant 0 : index
    %1 = vector.load %arg2[%c0_1, %c0_2] : memref<16x32xf32, #tpu.memory_space<vmem>>, vector<16x32xf32>
    %cst = arith.constant dense<0.000000e+00> : vector<8x32xf32>
    %2 = tpu.matmul %0, %1, %cst {dimension_numbers = #tpu.dot_dimension_numbers<[1], [0], [0], [1], [0, 0, 1, 1], [], []>} : vector<8x16xf32>, vector<16x32xf32>, vector<8x32xf32> -> vector<8x32xf32>
    %c0_3 = arith.constant 0 : index
    %c0_4 = arith.constant 0 : index
    %3 = vector.load %arg3[%c0_3, %c0_4] : memref<1x32xf32, #tpu.memory_space<vmem>>, vector<1x32xf32>
    %4 = vector.broadcast %3 : vector<1x32xf32> to vector<8x32xf32>
    %5 = arith.addf %2, %4 : vector<8x32xf32>
    %cst_5 = arith.constant 0.000000e+00 : f32
    %6 = vector.broadcast %cst_5 : f32 to vector<8x32xf32>
    %7 = arith.maximumf %5, %6 : vector<8x32xf32>
    %c0_6 = arith.constant 0 : index
    %c0_7 = arith.constant 0 : index
    %8 = vector.load %arg4[%c0_6, %c0_7] : memref<32x16xf32, #tpu.memory_space<vmem>>, vector<32x16xf32>
    %cst_8 = arith.constant dense<0.000000e+00> : vector<8x16xf32>
    %9 = tpu.matmul %7, %8, %cst_8 {dimension_numbers = #tpu.dot_dimension_numbers<[1], [0], [0], [1], [0, 0, 1, 1], [], []>} : vector<8x32xf32>, vector<32x16xf32>, vector<8x16xf32> -> vector<8x16xf32>
    %c0_9 = arith.constant 0 : index
    %c0_10 = arith.constant 0 : index
    %10 = vector.load %arg5[%c0_9, %c0_10] : memref<1x16xf32, #tpu.memory_space<vmem>>, vector<1x16xf32>
    %11 = vector.broadcast %10 : vector<1x16xf32> to vector<8x16xf32>
    %12 = arith.addf %9, %11 : vector<8x16xf32>
    %cst_11 = arith.constant 0.000000e+00 : f32
    %13 = vector.broadcast %cst_11 : f32 to vector<8x16xf32>
    %14 = arith.maximumf %12, %13 : vector<8x16xf32>
    %c0_12 = arith.constant 0 : index
    %c0_13 = arith.constant 0 : index
    %15 = vector.load %arg6[%c0_12, %c0_13] : memref<16x8xf32, #tpu.memory_space<vmem>>, vector<16x8xf32>
    %cst_14 = arith.constant dense<0.000000e+00> : vector<8x8xf32>
    %16 = tpu.matmul %14, %15, %cst_14 {dimension_numbers = #tpu.dot_dimension_numbers<[1], [0], [0], [1], [0, 0, 1, 1], [], []>} : vector<8x16xf32>, vector<16x8xf32>, vector<8x8xf32> -> vector<8x8xf32>
    %c0_15 = arith.constant 0 : index
    %c0_16 = arith.constant 0 : index
    %17 = vector.load %arg7[%c0_15, %c0_16] : memref<1x8xf32, #tpu.memory_space<vmem>>, vector<1x8xf32>
    %18 = vector.broadcast %17 : vector<1x8xf32> to vector<8x8xf32>
    %19 = arith.addf %16, %18 : vector<8x8xf32>
    %cst_17 = arith.constant 0.000000e+00 : f32
    %20 = vector.broadcast %cst_17 : f32 to vector<8x8xf32>
    %21 = arith.maximumf %19, %20 : vector<8x8xf32>
    %c0_18 = arith.constant 0 : index
    %c0_19 = arith.constant 0 : index
    %22 = vector.load %arg8[%c0_18, %c0_19] : memref<8x4xf32, #tpu.memory_space<vmem>>, vector<8x4xf32>
    %cst_20 = arith.constant dense<0.000000e+00> : vector<8x4xf32>
    %23 = tpu.matmul %21, %22, %cst_20 {dimension_numbers = #tpu.dot_dimension_numbers<[1], [0], [0], [1], [0, 0, 1, 1], [], []>} : vector<8x8xf32>, vector<8x4xf32>, vector<8x4xf32> -> vector<8x4xf32>
    %c0_21 = arith.constant 0 : index
    %c0_22 = arith.constant 0 : index
    %24 = vector.load %arg9[%c0_21, %c0_22] : memref<1x4xf32, #tpu.memory_space<vmem>>, vector<1x4xf32>
    %25 = vector.broadcast %24 : vector<1x4xf32> to vector<8x4xf32>
    %26 = arith.addf %23, %25 : vector<8x4xf32>
    %cst_23 = arith.constant 0.000000e+00 : f32
    %27 = vector.broadcast %cst_23 : f32 to vector<8x4xf32>
    %28 = arith.maximumf %26, %27 : vector<8x4xf32>
    %c0_24 = arith.constant 0 : index
    %c0_25 = arith.constant 0 : index
    %29 = vector.load %arg10[%c0_24, %c0_25] : memref<4x1xf32, #tpu.memory_space<vmem>>, vector<4x1xf32>
    %cst_26 = arith.constant dense<0.000000e+00> : vector<8x1xf32>
    %30 = tpu.matmul %28, %29, %cst_26 {dimension_numbers = #tpu.dot_dimension_numbers<[1], [0], [0], [1], [0, 0, 1, 1], [], []>} : vector<8x4xf32>, vector<4x1xf32>, vector<8x1xf32> -> vector<8x1xf32>
    %c0_27 = arith.constant 0 : index
    %c0_28 = arith.constant 0 : index
    %31 = vector.load %arg11[%c0_27, %c0_28] : memref<1x1xf32, #tpu.memory_space<vmem>>, vector<1x1xf32>
    %32 = vector.broadcast %31 : vector<1x1xf32> to vector<8x1xf32>
    %33 = arith.addf %30, %32 : vector<8x1xf32>
    %c0_29 = arith.constant 0 : index
    %c0_30 = arith.constant 0 : index
    %34 = vector.load %arg12[%c0_29, %c0_30] : memref<8x1xf32, #tpu.memory_space<vmem>>, vector<8x1xf32>
    tpu.vector_store %arg12[%c0_29, %c0_30], %33 {strides = array<i32>} : memref<8x1xf32, #tpu.memory_space<vmem>>, vector<8x1xf32>,
    return
  }
  func.func @transform_0(%arg0: i32) -> (i32, i32) {
    %c0_i32 = arith.constant 0 : i32
    %c0_i32_0 = arith.constant 0 : i32
    return %arg0, %c0_i32 : i32, i32
  }
  func.func @transform_1(%arg0: i32) -> (i32, i32) {
    %c0_i32 = arith.constant 0 : i32
    %c0_i32_0 = arith.constant 0 : i32
    %c0_i32_1 = arith.constant 0 : i32
    return %c0_i32, %c0_i32_0 : i32, i32
  }
  func.func @transform_2(%arg0: i32) -> (i32, i32) {
    %c0_i32 = arith.constant 0 : i32
    %c0_i32_0 = arith.constant 0 : i32
    %c0_i32_1 = arith.constant 0 : i32
    return %c0_i32, %c0_i32_0 : i32, i32
  }
  func.func @transform_3(%arg0: i32) -> (i32, i32) {
    %c0_i32 = arith.constant 0 : i32
    %c0_i32_0 = arith.constant 0 : i32
    %c0_i32_1 = arith.constant 0 : i32
    return %c0_i32, %c0_i32_0 : i32, i32
  }
  func.func @transform_4(%arg0: i32) -> (i32, i32) {
    %c0_i32 = arith.constant 0 : i32
    %c0_i32_0 = arith.constant 0 : i32
    %c0_i32_1 = arith.constant 0 : i32
    return %c0_i32, %c0_i32_0 : i32, i32
  }
  func.func @transform_5(%arg0: i32) -> (i32, i32) {
    %c0_i32 = arith.constant 0 : i32
    %c0_i32_0 = arith.constant 0 : i32
    %c0_i32_1 = arith.constant 0 : i32
    return %c0_i32, %c0_i32_0 : i32, i32
  }
  func.func @transform_6(%arg0: i32) -> (i32, i32) {
    %c0_i32 = arith.constant 0 : i32
    %c0_i32_0 = arith.constant 0 : i32
    %c0_i32_1 = arith.constant 0 : i32
    return %c0_i32, %c0_i32_0 : i32, i32
  }
  func.func @transform_7(%arg0: i32) -> (i32, i32) {
    %c0_i32 = arith.constant 0 : i32
    %c0_i32_0 = arith.constant 0 : i32
    %c0_i32_1 = arith.constant 0 : i32
    return %c0_i32, %c0_i32_0 : i32, i32
  }
  func.func @transform_8(%arg0: i32) -> (i32, i32) {
    %c0_i32 = arith.constant 0 : i32
    %c0_i32_0 = arith.constant 0 : i32
    %c0_i32_1 = arith.constant 0 : i32
    return %c0_i32, %c0_i32_0 : i32, i32
  }
  func.func @transform_9(%arg0: i32) -> (i32, i32) {
    %c0_i32 = arith.constant 0 : i32
    %c0_i32_0 = arith.constant 0 : i32
    %c0_i32_1 = arith.constant 0 : i32
    return %c0_i32, %c0_i32_0 : i32, i32
  }
  func.func @transform_10(%arg0: i32) -> (i32, i32) {
    %c0_i32 = arith.constant 0 : i32
    %c0_i32_0 = arith.constant 0 : i32
    %c0_i32_1 = arith.constant 0 : i32
    return %c0_i32, %c0_i32_0 : i32, i32
  }
  func.func @transform_11(%arg0: i32) -> (i32, i32) {
    %c0_i32 = arith.constant 0 : i32
    %c0_i32_0 = arith.constant 0 : i32
    return %arg0, %c0_i32 : i32, i32
  }
}

</mosaic_0001>

<bundles_post_ra>
// kernel: tpu_custom_call.1
= control target key start
LH: loop header
LB: loop body
LE: loop exit
PB: predicated region body
PF: predicated region fallthrough
CT: control target
= control target key end

     0   :  { %v532_v0 = vmov 0.0   ;;  %vm533_vm0 = vmmov 0   ;;  %vm50_vm1 = vcmask 130048   ;;  %vm136_vm2 = vcmask 261120   ;;  %s652_s1 = inlined_call_operand.vmem [shape: f32[16,32], index: 1, kind: input, shape index: {}]   ;;  %s653_s0 = inlined_call_operand.vmem [shape: f32[8,16], index: 0, kind: input, shape index: {}]   ;;  %s654_s3 = inlined_call_operand.vmem [shape: f32[32,16], index: 3, kind: input, shape index: {}]   ;;  %s655_s2 = inlined_call_operand.vmem [shape: f32[1,32], index: 2, kind: input, shape index: {}]   ;;  %s656_s5 = inlined_call_operand.vmem [shape: f32[16,8], index: 5, kind: input, shape index: {}]   ;;  %s657_s4 = inlined_call_operand.vmem [shape: f32[1,16], index: 4, kind: input, shape index: {}]   ;;  %s658_s7 = inlined_call_operand.vmem [shape: f32[8,4], index: 7, kind: input, shape index: {}]   ;;  %s659_s6 = inlined_call_operand.vmem [shape: f32[1,8], index: 6, kind: input, shape index: {}]   ;;  %s660_s9 = inlined_call_operand.vmem [shape: f32[4,1], index: 9, kind: input, shape index: {}]   ;;  %s661_s10 = inlined_call_operand.<no memory space> [shape: f32[1,1], index: 10, kind: input, shape index: {}]   ;;  %s662_s8 = inlined_call_operand.vmem [shape: f32[1,4], index: 8, kind: input, shape index: {}]   ;;  %s663_s11 = inlined_call_operand.vmem [shape: f32[8,1], index: 11, kind: output, shape index: {}]  }
   0x1   :  { %495 = vmatprep.subr.mxu0 %v532_v0  ;;  %v42_v1 = vld [vmem:[%s652_s1 + $0x8] sm:$0xff]  ;;  %v41_v2 = vld [vmem:[%s652_s1] sm:$0xff]  ;;  %499 = vmatprep.mubr.msk.f32.mxu0 %vm533_vm0, %v532_v0  ;;  %v128_v4 = vld [vmem:[%s654_s3 + $0x18] sm:$0xff]  ;;  %vm302_vm3 = vcmask 64512   ;;  %vm389_vm4 = vcmask 1043456   ;;  %v16_v27 = vstv %s661_s10  ;;  %vm385_vm5 = vcmask 31744  }
   0x2   :  { %496 = vmatpush3.msra.mxu0 %v42_v1  ;;  %v40_v3 = vld [vmem:[%s653_s0] sm:$0xff]  ;;  %502 = vmatprep.subr.mxu1 %v532_v0  ;;  %v127_v5 = vld [vmem:[%s654_s3 + $0x10] sm:$0xff]  ;;  %v126_v6 = vld [vmem:[%s654_s3 + $0x8] sm:$0xff]  ;;  %17 = vst [vmem:[#allocation2] sm:$0x1] %v16_v27  ;;  %vm463_vm6 = vcmask 7168  }
   0x3   :  { %497 = vmatprep.subr.mxu0 %v532_v0  ;;  %503 = vmatpush3.msra.mxu1 %v128_v4  ;;  %v125_v7 = vld [vmem:[%s654_s3] sm:$0xff]  ;;  %v212_v13 = vld [vmem:[%s656_s5 + $0x8] sm:$0xff] }
   0x4   :  { %498 = vmatpush3.msra.mxu0 %v41_v2  ;;  %504 = vmatprep.subr.mxu1 %v532_v0  ;;  %v469_v8 = vld [vmem:[%s655_s2] ss:$0 sm:$0xff] }
   0x5   :  { %500 = vmatmul.mubr.msk.f32.vlgmr.msra.gmra.mxu0 %vm50_vm1, %v40_v3  ;;  %510 = vmatprep.mubr.msk.f32.mxu1 %vm533_vm0, %v532_v0  ;;  %v211_v14 = vld [vmem:[%s656_s5] sm:$0xff] }
   0x6   :  { %513 = vmatprep.subr.mxu0 %v532_v0  ;;  %517 = vmatprep.mubr.msk.f32.mxu0 %vm533_vm0, %v532_v0  ;;  %v471_v15 = vld [vmem:[%s657_s4] ss:$0 sm:$0xff] }
   0x7   :  { %505 = vmatpush3.msra.mxu1 %v127_v5  ;;  %514 = vmatpush3.msra.mxu0 %v212_v13  ;;  %v294_v20 = vld [vmem:[%s658_s7] sm:$0xff] }
   0x8   :  { %506 = vmatprep.subr.mxu1 %v532_v0  ;;  %515 = vmatprep.subr.mxu0 %v532_v0  ;;  %v473_v21 = vld [vmem:[%s659_s6] ss:$0 sm:$0xff] }
   0x9   :  { %507 = vmatpush3.msra.mxu1 %v126_v6  ;;  %516 = vmatpush3.msra.mxu0 %v211_v14  ;;  %v377_v26 = vld [vmem:[%s660_s9] sm:$0xf] }
   0xa   :  { %508 = vmatprep.subr.mxu1 %v532_v0  ;;  %520 = vmatprep.subr.mxu0 %v532_v0  ;;  %v475_v28 = vld [vmem:[%s662_s8] ss:$0 sm:$0xff] }
   0xb   :  { %509 = vmatpush3.msra.mxu1 %v125_v7  ;;  %v477_v33 = vld [vmem:[#allocation2] ss:$0 sm:$0xff] }
   0xc   :  { %525 = vmatprep.subr.mxu1 %v532_v0 }
  0xc5   :  { %v120_v9 = vpop.f32.mrf.mxu0 }
  0xc6   :  { %v121_v10 = vadd.f32 %v469_v8, %v120_v9 }
  0xc7   :  { %v501_v11 = vpop.f32.mrf.mxu0 }
  0xc8   :  { %v124_v12 = vmax.f32 %v121_v10, 0.0 }
  0xca   :  { %511 = vmatmul.mubr.msk.f32.vlgmr.msra.gmra.mxu1 %vm136_vm2, %v124_v12 }
  0xcb   :  { %527 = vmatprep.mubr.msk.f32.mxu1 %vm533_vm0, %v532_v0  ;;  %526 = vmatpush3.msk.msra.mxu1 %vm389_vm4, %v377_v26 }
 0x18a   :  { %v206_v16 = vpop.f32.mrf.mxu1 }
 0x18b   :  { %v207_v17 = vadd.f32 %v471_v15, %v206_v16 }
 0x18c   :  { %v512_v18 = vpop.f32.mrf.mxu1 }
 0x18d   :  { %v210_v19 = vmax.f32 %v207_v17, 0.0 }
 0x18f   :  { %518 = vmatmul.mubr.msk.f32.vlgmr.msra.gmra.mxu0 %vm50_vm1, %v210_v19 }
 0x190   :  { %522 = vmatprep.mubr.msk.f32.mxu0 %vm533_vm0, %v532_v0  ;;  %521 = vmatpush3.msra.mxu0 %v294_v20 }
 0x24f   :  { %v289_v22 = vpop.f32.mrf.mxu0 }
 0x250   :  { %v290_v23 = vadd.f32 %v473_v21, %v289_v22 }
 0x251   :  { %v519_v24 = vpop.f32.mrf.mxu0 }
 0x252   :  { %v293_v25 = vmax.f32 %v290_v23, 0.0 }
 0x254   :  { %523 = vmatmul.mubr.msk.f32.vlgmr.msra.gmra.mxu0 %vm302_vm3, %v293_v25 }
 0x314   :  { %v372_v29 = vpop.f32.mrf.mxu0 }
 0x315   :  { %v373_v30 = vadd.f32 %v475_v28, %v372_v29 }
 0x316   :  { %v524_v31 = vpop.f32.mrf.mxu0 }
 0x317   :  { %v376_v32 = vmax.f32 %v373_v30, 0.0 }
 0x319   :  { %528 = vmatmul.mubr.msk.f32.vlgmr.msra.gmra.mxu1 %vm385_vm5, %v376_v32 }
 0x3d9   :  { %v459_v34 = vpop.f32.mrf.mxu1 }
 0x3da   :  { %v460_v35 = vadd.f32 %v477_v33, %v459_v34 }
 0x3db   :  { %v529_v36 = vpop.f32.mrf.mxu1 }
 0x3dc   :  { %464 = vst.msk [vmem:[%s663_s11] sm:$0xff] %vm463_vm6, %v460_v35 }

</bundles_post_ra>
